<compile_context>
chip_gen: v5e
topology: v5e:2x2
jax: 0.10.0
libtpu: 0.0.40
codegen_flags: <defaults>
</compile_context>

<pallas_src>
import functools

import jax
import jax.numpy as jnp
from jax.experimental import pallas as pl
from jax.experimental.pallas import tpu as pltpu

KLD_TEMP = 4.0
KLD_LAMBDA = 0.75
MAX_CLASS_SLAB = 2048          # f32 working-slab width for the large-C path


def _round_up(x, m):
    return -(-x // m) * m


def _fold_lanes(x, n_cols):
    """Fold (rows, n_cols) -> (rows, 128) preserving per-row sums.

    The 128-aligned part is folded with pure VPU adds (static lane-block
    slices); any <128-lane remainder is cross-lane reduced and deposited in
    lane 0.
    """
    rows = x.shape[0]
    n_full = n_cols // 128
    acc = None
    for j in range(n_full):
        blk = x[:, j * 128:(j + 1) * 128]
        acc = blk if acc is None else acc + blk
    rem_cols = n_cols - n_full * 128
    if rem_cols:
        rem = jnp.sum(x[:, n_full * 128:], axis=-1, keepdims=True)  # (rows,1)
        lane = jax.lax.broadcasted_iota(jnp.int32, (rows, 128), 1)
        rem_blk = jnp.where(lane == 0, rem, 0.0)
        acc = rem_blk if acc is None else acc + rem_blk
    return acc


def _distill_kernel(t_ref, s_ref, o_ref, *, temp, batch, tile_b, n_classes,
                    c_slab, ragged):
    inv_temp = 1.0 / temp
    n_slabs = -(-n_classes // c_slab)

    if ragged:
        i = pl.program_id(0)
        row_ids = (jax.lax.broadcasted_iota(jnp.int32, (tile_b, 1), 0)
                   + i * tile_b)
        valid = row_ids < batch                                # (tile_b, 1)

    if n_slabs == 1:
        # ---------------- monolithic path (C fits one slab) ----------------
        t = t_ref[...].astype(jnp.float32) * inv_temp
        s = s_ref[...].astype(jnp.float32) * inv_temp

        t_max = jnp.max(t, axis=-1, keepdims=True)
        t_shift = t - t_max
        t_exp = jnp.exp(t_shift)
        t_l = jnp.sum(t_exp, axis=-1, keepdims=True)

        s_max = jnp.max(s, axis=-1, keepdims=True)
        s_shift = s - s_max
        s_lse = jnp.log(jnp.sum(jnp.exp(s_shift), axis=-1, keepdims=True))

        # log p - log q = (t_shift - s_shift) + (s_lse - log t_l)
        row_bias = s_lse - jnp.log(t_l)                        # (tile_b, 1)
        kl = t_exp * ((t_shift - s_shift) + row_bias)          # (tile_b, C)
        acc = _fold_lanes(kl, n_classes)                       # (tile_b, 128)
    else:
        # ---------------- large-C path: two-pass slab-wise LSE -------------
        n_full = n_classes // c_slab
        tail_w = n_classes - n_full * c_slab

        def load_slab(ref, start, width):
            return ref[:, pl.ds(start, width)].astype(jnp.float32) * inv_temp

        def lse_update(m, l, x):
            xm = jnp.max(x, axis=-1, keepdims=True)
            mn = jnp.maximum(m, xm)
            l = l * jnp.exp(m - mn) + jnp.sum(jnp.exp(x - mn), axis=-1,
                                              keepdims=True)
            return mn, l

        neg = jnp.full((tile_b, 1), -1e30, jnp.float32)
        zero = jnp.zeros((tile_b, 1), jnp.float32)

        # pass 1: online log-sum-exp row stats for teacher & student
        def pass1_body(j, carry):
            t_m, t_l, s_m, s_l = carry
            start = pl.multiple_of(j * c_slab, 128)
            t_m, t_l = lse_update(t_m, t_l, load_slab(t_ref, start, c_slab))
            s_m, s_l = lse_update(s_m, s_l, load_slab(s_ref, start, c_slab))
            return t_m, t_l, s_m, s_l

        t_m, t_l, s_m, s_l = jax.lax.fori_loop(
            0, n_full, pass1_body, (neg, zero, neg, zero))
        if tail_w:
            t_m, t_l = lse_update(
                t_m, t_l, load_slab(t_ref, n_full * c_slab, tail_w))
            s_m, s_l = lse_update(
                s_m, s_l, load_slab(s_ref, n_full * c_slab, tail_w))

        row_bias = (s_m + jnp.log(s_l)) - (t_m + jnp.log(t_l))  # (tile_b, 1)

        # pass 2: accumulate exp(t - t_m) * ((t - s) + bias) lane-blocks
        def kl_slab(start, width):
            t_j = load_slab(t_ref, start, width)
            s_j = load_slab(s_ref, start, width)
            return jnp.exp(t_j - t_m) * ((t_j - s_j) + row_bias)

        def pass2_body(j, acc):
            start = pl.multiple_of(j * c_slab, 128)
            return acc + _fold_lanes(kl_slab(start, c_slab), c_slab)

        acc = jax.lax.fori_loop(
            0, n_full, pass2_body, jnp.zeros((tile_b, 128), jnp.float32))
        if tail_w:
            acc = acc + _fold_lanes(kl_slab(n_full * c_slab, tail_w), tail_w)

    # Per-row 1/sum_exp(teacher) factor applied to the folded (tile_b, 128)
    # partial (not the full (tile_b, C) array).  Ragged masking is per-row /
    # per-(tile_b,128) only; padded-row garbage (possibly NaN/Inf) is
    # confined to its rows and zeroed here before the multiply (0*0 = 0).
    row_factor = pl.reciprocal(t_l, approx=False)              # (tile_b, 1)
    if ragged:
        row_factor = jnp.where(valid, row_factor, 0.0)
        acc = jnp.where(valid, acc, 0.0)
    acc = acc * row_factor                                     # (tile_b, 128)

    # Sublane fold to a lane-dense (8, 128) partial (tile-aligned reshape).
    partial = acc.reshape(tile_b // 8, 8, 128).sum(axis=0)
    o_ref[0] = partial


def _vmem_budget():
    """(tile budget bytes, vmem_limit_bytes), sized per TPU generation."""
    vmem_bytes = 64 * 1024 * 1024          # conservative default (v7x per-TC)
    try:
        vmem_bytes = int(pltpu.get_tpu_info().vmem_capacity_bytes)
    except Exception:
        pass
    limit = min((vmem_bytes * 3) // 4, 96 * 1024 * 1024)
    budget = (limit * 7) // 10             # headroom for compiler scratch
    return budget, limit


def _choose_tile_b(batch, n_classes, itemsize, live_c, *, budget_bytes,
                   row_align=16, max_rows=2048):
    # Per-row VMEM footprint:
    #   * 2 inputs x 2 pipeline buffers of the (tile_b, C) block @ input dtype
    #   * ~6 live f32 temporaries of the in-kernel working slab (live_c wide)
    per_row = 4 * n_classes * itemsize + 6 * live_c * 4
    rows = max(row_align, (budget_bytes // per_row) // row_align * row_align)
    rows = min(rows, max_rows)
    if batch >= 2 * row_align:
        # keep >= 2 grid chunks so both v7x TensorCores get work
        rows = min(rows, _round_up(pl.cdiv(batch, 2), row_align))
    rows = min(rows, _round_up(batch, row_align))
    return max(rows, row_align)


def distillation_loss(teacher_logits, student_logits,
                      kld_temp=KLD_TEMP, kld_lambda=KLD_LAMBDA,
                      tile_b=None, class_slab=None):
    assert teacher_logits.shape == student_logits.shape
    assert teacher_logits.ndim == 2
    B, C = teacher_logits.shape
    itemsize = max(jnp.dtype(teacher_logits.dtype).itemsize,
                   jnp.dtype(student_logits.dtype).itemsize)

    # Class-slab width for the large-C two-pass path (128-aligned).  When the
    # slab covers all of C the kernel uses the single-pass monolithic path.
    if class_slab is None:
        c_slab = C if C <= MAX_CLASS_SLAB else MAX_CLASS_SLAB
    else:
        c_slab = min(_round_up(int(class_slab), 128), _round_up(C, 128))

    budget_bytes, vmem_limit = _vmem_budget()
    if tile_b is None:
        tile_b = _choose_tile_b(B, C, itemsize, min(c_slab, C),
                                budget_bytes=budget_bytes)
    else:
        tile_b = max(8, _round_up(int(tile_b), 8))   # sublane-fold alignment

    num_chunks = pl.cdiv(B, tile_b)
    ragged = (B % tile_b) != 0

    # batchmean divides by the batch size (first dim of KLDivLoss input).
    scale = kld_lambda * (kld_temp ** 2) / float(B)

    kernel = functools.partial(
        _distill_kernel, temp=float(kld_temp), batch=B, tile_b=tile_b,
        n_classes=C, c_slab=c_slab, ragged=ragged)

    cost = pl.CostEstimate(
        flops=10 * B * C,
        transcendentals=2 * B * C,
        bytes_accessed=2 * B * C * itemsize + num_chunks * 8 * 128 * 4,
    )

    partials = pl.pallas_call(
        kernel,
        out_shape=jax.ShapeDtypeStruct((num_chunks, 8, 128), jnp.float32),
        grid_spec=pltpu.PrefetchScalarGridSpec(
            num_scalar_prefetch=0,
            grid=(num_chunks,),
            in_specs=[
                pl.BlockSpec((tile_b, C), lambda i: (i, 0)),
                pl.BlockSpec((tile_b, C), lambda i: (i, 0)),
            ],
            out_specs=pl.BlockSpec((1, 8, 128), lambda i: (i, 0, 0)),
        ),
        compiler_params=pltpu.CompilerParams(
            dimension_semantics=("parallel",),
            vmem_limit_bytes=vmem_limit,
        ),
        cost_estimate=cost,
    )(teacher_logits, student_logits)

    # TODO(synk): optional bf16-exp fast path for v6e/v7x (EUP-bound with
    # bf16 inputs) once accuracy impact is validated; f32 kept for exactness.
    return jnp.sum(partials) * scale


def _reference_loss(teacher_logits, student_logits,
                    kld_temp=KLD_TEMP, kld_lambda=KLD_LAMBDA):
    t = teacher_logits.astype(jnp.float32) / kld_temp
    s = student_logits.astype(jnp.float32) / kld_temp
    p = jax.nn.softmax(t, axis=-1)
    log_q = jax.nn.log_softmax(s, axis=-1)
    log_p = jax.nn.log_softmax(t, axis=-1)
    kld = jnp.sum(p * (log_p - log_q)) / teacher_logits.shape[0]
    return kld_lambda * kld * kld_temp ** 2


if __name__ == "__main__":
    key = jax.random.PRNGKey(0)
    k1, k2, k3, k4, k5, k6 = jax.random.split(key, 6)

    # --- test 1: small, aligned, f32 (monolithic path, no masking) ---
    B, C = 16, 128
    teacher = jax.random.normal(k1, (B, C), dtype=jnp.float32) * 2.0
    student = jax.random.normal(k2, (B, C), dtype=jnp.float32) * 2.0
    loss = jax.block_until_ready(distillation_loss(teacher, student))
    ref = _reference_loss(teacher, student)
    assert jnp.allclose(loss, ref, rtol=1e-5, atol=1e-6), (loss, ref)

    # --- test 2: ragged batch, multi-chunk grid, multi-lane-block C, bf16 ---
    B2, C2 = 200, 384
    teacher2 = (jax.random.normal(k3, (B2, C2), dtype=jnp.float32) * 2.0
                ).astype(jnp.bfloat16)
    student2 = (jax.random.normal(k4, (B2, C2), dtype=jnp.float32) * 2.0
                ).astype(jnp.bfloat16)
    loss2 = jax.block_until_ready(
        distillation_loss(teacher2, student2, tile_b=64))
    ref2 = _reference_loss(teacher2, student2)
    assert jnp.allclose(loss2, ref2, rtol=1e-4, atol=1e-5), (loss2, ref2)

    # --- test 3: large-C slab path (online LSE), ragged rows, lane remainder
    B3, C3 = 40, 300
    teacher3 = jax.random.normal(k5, (B3, C3), dtype=jnp.float32) * 2.0
    student3 = jax.random.normal(k6, (B3, C3), dtype=jnp.float32) * 2.0
    loss3 = jax.block_until_ready(
        distillation_loss(teacher3, student3, tile_b=16, class_slab=128))
    ref3 = _reference_loss(teacher3, student3)
    assert jnp.allclose(loss3, ref3, rtol=1e-4, atol=1e-6), (loss3, ref3)

    print("KERNEL_OK")
</pallas_src>

<mosaic_0001>
module attributes {stable_mosaic.version = 11 : i64} {
  func.func @_distill_kernel(%arg0: i32, %arg1: memref<16x128xf32, #tpu.memory_space<vmem>>, %arg2: memref<16x128xf32, #tpu.memory_space<vmem>>, %arg3: memref<1x8x128xf32, #tpu.memory_space<vmem>>) attributes {dimension_semantics = [#tpu.dimension_semantics<parallel>], iteration_bounds = array<i64: 1>, scalar_prefetch = 0 : i64, scratch_operands = 0 : i64, tpu.core_type = #tpu.core_type<tc>, window_params = [{transform_indices = @transform_0, window_bounds = array<i64: 16, 128>}, {transform_indices = @transform_1, window_bounds = array<i64: 16, 128>}, {transform_indices = @transform_2, window_bounds = array<i64: 1, 8, 128>}]} {
    %c0 = arith.constant 0 : index
    %c0_0 = arith.constant 0 : index
    %0 = vector.load %arg1[%c0, %c0_0] : memref<16x128xf32, #tpu.memory_space<vmem>>, vector<16x128xf32>
    %cst = arith.constant 2.500000e-01 : f32
    %1 = vector.broadcast %cst : f32 to vector<16x128xf32>
    %2 = arith.mulf %0, %1 : vector<16x128xf32>
    %c0_1 = arith.constant 0 : index
    %c0_2 = arith.constant 0 : index
    %3 = vector.load %arg2[%c0_1, %c0_2] : memref<16x128xf32, #tpu.memory_space<vmem>>, vector<16x128xf32>
    %cst_3 = arith.constant 2.500000e-01 : f32
    %4 = vector.broadcast %cst_3 : f32 to vector<16x128xf32>
    %5 = arith.mulf %3, %4 : vector<16x128xf32>
    %cst_4 = arith.constant dense<0xFF800000> : vector<16xf32>
    %6 = vector.multi_reduction <maximumf>, %2, %cst_4 [1] : vector<16x128xf32> to vector<16xf32>
    %7 = vector.shape_cast %6 : vector<16xf32> to vector<16x1xf32>
    %8 = vector.broadcast %7 : vector<16x1xf32> to vector<16x128xf32>
    %9 = arith.subf %2, %8 : vector<16x128xf32>
    %10 = math.exp %9 : vector<16x128xf32>
    %cst_5 = arith.constant dense<0.000000e+00> : vector<16xf32>
    %11 = vector.multi_reduction <add>, %10, %cst_5 [1] : vector<16x128xf32> to vector<16xf32>
    %12 = vector.shape_cast %11 : vector<16xf32> to vector<16x1xf32>
    %cst_6 = arith.constant dense<0xFF800000> : vector<16xf32>
    %13 = vector.multi_reduction <maximumf>, %5, %cst_6 [1] : vector<16x128xf32> to vector<16xf32>
    %14 = vector.shape_cast %13 : vector<16xf32> to vector<16x1xf32>
    %15 = vector.broadcast %14 : vector<16x1xf32> to vector<16x128xf32>
    %16 = arith.subf %5, %15 : vector<16x128xf32>
    %17 = math.exp %16 : vector<16x128xf32>
    %cst_7 = arith.constant dense<0.000000e+00> : vector<16xf32>
    %18 = vector.multi_reduction <add>, %17, %cst_7 [1] : vector<16x128xf32> to vector<16xf32>
    %19 = vector.shape_cast %18 : vector<16xf32> to vector<16x1xf32>
    %20 = math.log %19 : vector<16x1xf32>
    %21 = math.log %12 : vector<16x1xf32>
    %22 = arith.subf %20, %21 : vector<16x1xf32>
    %23 = arith.subf %9, %16 : vector<16x128xf32>
    %24 = vector.broadcast %22 : vector<16x1xf32> to vector<16x128xf32>
    %25 = arith.addf %23, %24 : vector<16x128xf32>
    %26 = arith.mulf %10, %25 : vector<16x128xf32>
    %27 = tpu.reciprocal %12 : vector<16x1xf32> -> vector<16x1xf32>
    %28 = vector.broadcast %27 : vector<16x1xf32> to vector<16x128xf32>
    %29 = arith.mulf %26, %28 : vector<16x128xf32>
    %30 = vector.shape_cast %29 : vector<16x128xf32> to vector<2x8x128xf32>
    %cst_8 = arith.constant dense<0.000000e+00> : vector<8x128xf32>
    %31 = vector.multi_reduction <add>, %30, %cst_8 [0] : vector<2x8x128xf32> to vector<8x128xf32>
    %c0_9 = arith.constant 0 : index
    %c0_10 = arith.constant 0 : index
    %c0_11 = arith.constant 0 : index
    %32 = vector.load %arg3[%c0_9, %c0_10, %c0_11] : memref<1x8x128xf32, #tpu.memory_space<vmem>>, vector<1x8x128xf32>
    %33 = vector.shape_cast %32 : vector<1x8x128xf32> to vector<8x128xf32>
    %34 = vector.shape_cast %31 : vector<8x128xf32> to vector<1x8x128xf32>
    tpu.vector_store %arg3[%c0_9, %c0_10, %c0_11], %34 {strides = array<i32>} : memref<1x8x128xf32, #tpu.memory_space<vmem>>, vector<1x8x128xf32>,
    return
  }
  func.func @transform_0(%arg0: i32) -> (i32, i32) {
    %c0_i32 = arith.constant 0 : i32
    %c0_i32_0 = arith.constant 0 : i32
    return %arg0, %c0_i32 : i32, i32
  }
  func.func @transform_1(%arg0: i32) -> (i32, i32) {
    %c0_i32 = arith.constant 0 : i32
    %c0_i32_0 = arith.constant 0 : i32
    return %arg0, %c0_i32 : i32, i32
  }
  func.func @transform_2(%arg0: i32) -> (i32, i32, i32) {
    %c0_i32 = arith.constant 0 : i32
    %c0_i32_0 = arith.constant 0 : i32
    %c0_i32_1 = arith.constant 0 : i32
    return %arg0, %c0_i32, %c0_i32_0 : i32, i32, i32
  }
}

</mosaic_0001>

<bundles_post_ra>
// kernel: tpu_custom_call.1
= control target key start
LH: loop header
LB: loop body
LE: loop exit
PB: predicated region body
PF: predicated region fallthrough
CT: control target
= control target key end

     0   :  { %7 = vsyncpa [#allocation3], 0  ;;  %s278_s0 = inlined_call_operand.hbm [shape: f32[16,128], index: 0, kind: input, shape index: {}]   ;;  %s279_s1 = inlined_call_operand.hbm [shape: f32[16,128], index: 1, kind: input, shape index: {}]   ;;  %s280_s2 = inlined_call_operand.hbm [shape: f32[1,8,128], index: 2, kind: output, shape index: {}]  }
   0x1   :  { %8 = vsyncpa [#allocation6], 0 }
   0x2   :  { %9 = vsyncpa [#allocation4], 0  ;;  %s14_s11 = sshll.u32 %s278_s0, 4  ;;  %s249_s12 = smov [#allocation2]   ;;  %s15_s11 = int_to_ptr.hbm [resolvable:$true] %s14_s11 }
   0x3   :  { %s16_s13 = sshll.u32 %s249_s12, 4  ;;  %s27_s16 = sshll.u32 %s279_s1, 4  ;;  %s17_s13 = int_to_ptr.vmem [resolvable:$true] %s16_s13  ;;  %s28_s16 = int_to_ptr.hbm [resolvable:$true] %s27_s16 }
   0x4   :  { %s250_s17 = smov 128   ;;  %s251_s18 = smov 8  }
   0x5   :  { %22 = dma.hbm_to_vmem [thread:$0]  %s15_s11, 256, %s17_s13, [#allocation3], %s250_s17, %s250_s17, %s251_s18  }
   0x6   :  { %s252_s19 = smov [#allocation5]  }
   0x7   :  { %s29_s20 = sshll.u32 %s252_s19, 4  ;;  %s30_s20 = int_to_ptr.vmem [resolvable:$true] %s29_s20 }
   0x8   :  { %35 = dma.hbm_to_vmem [thread:$0]  %s28_s16, 256, %s30_s20, [#allocation6], %s250_s17, %s250_s17, %s251_s18  }
   0x9   :  { %243 = dma.done.wait [#allocation3], 256  }
   0xa   :  { %244 = vsyncadd [#allocation3], 4294967040 }
   0xb   :  { %245 = dma.done.wait [#allocation6], 256  }
   0xc   :  { %246 = vsyncadd [#allocation6], 4294967040  ;;  %v48_v0 = vld [vmem:[#allocation5] sm:$0xff]  ;;  %v44_v1 = vld [vmem:[#allocation2] sm:$0xff]  ;;  %s253_s0 = smov [#allocation7]   ;;  %s135_s23 = sshll.u32 %s280_s2, 4  ;;  %s136_s23 = int_to_ptr.hbm [resolvable:$true] %s135_s23 }
   0xd   :  { %v50_v2 = vmul.f32 0.25, %v48_v0  ;;  %v46_v3 = vmul.f32 0.25, %v44_v1  ;;  %v49_v4 = vld [vmem:[#allocation5 + $0x8] sm:$0xff]  ;;  %v45_v5 = vld [vmem:[#allocation2 + $0x8] sm:$0xff]  ;;  %s133_s1 = sshll.u32 %s253_s0, 4  ;;  %s134_s1 = int_to_ptr.vmem [resolvable:$true] %s133_s1 }
   0xe   :  { %v51_v6 = vmul.f32 0.25, %v49_v4  ;;  %v47_v7 = vmul.f32 0.25, %v45_v5 }
   0xf   :  { %66 = vmax.xlane.f32.xlu1 %v50_v2  ;;  %52 = vmax.xlane.f32.xlu0 %v46_v3 }
  0x17   :  { %68 = vmax.xlane.f32.xlu1 %v51_v6  ;;  %54 = vmax.xlane.f32.xlu0 %v47_v7 }
  0x82   :  { %v67_v8 = vpop.xlane.xlu1 %66  ;;  %v53_v9 = vpop.xlane.xlu0 %52 }
  0x83   :  { %v70_v10 = vsub.f32 %v50_v2, %v67_v8  ;;  %v56_v11 = vsub.f32 %v46_v3, %v53_v9 }
  0x85   :  { %v72_v12 = vmul.f32 1.442695, %v70_v10  ;;  %v58_v13 = vmul.f32 1.442695, %v56_v11  ;;  %v90_v14 = vsub.f32 %v56_v11, %v70_v10 }
  0x87   :  { %151 = vpow2.f32 %v72_v12 }
  0x88   :  { %153 = vpow2.f32 %v58_v13 }
  0x8a   :  { %v69_v15 = vpop.xlane.xlu1 %68  ;;  %v55_v16 = vpop.xlane.xlu0 %54 }
  0x8b   :  { %v71_v17 = vsub.f32 %v51_v6, %v69_v15  ;;  %v57_v18 = vsub.f32 %v47_v7, %v55_v16 }
  0x8d   :  { %v152_v19 = vpop.eup %151  ;;  %v74_v20 = vmul.f32 1.442695, %v71_v17  ;;  %v60_v21 = vmul.f32 1.442695, %v57_v18  ;;  %v91_v22 = vsub.f32 %v57_v18, %v71_v17 }
  0x8e   :  { %v154_v23 = vpop.eup %153  ;;  %76 = vadd.xlane.f32.xlu0 %v152_v19 }
  0x8f   :  { %155 = vpow2.f32 %v74_v20  ;;  %62 = vadd.xlane.f32.xlu2 %v154_v23 }
  0x90   :  { %157 = vpow2.f32 %v60_v21 }
  0x95   :  { %v156_v24 = vpop.eup %155 }
  0x96   :  { %v158_v25 = vpop.eup %157  ;;  %78 = vadd.xlane.f32.xlu1 %v156_v24 }
  0x97   :  { %64 = vadd.xlane.f32.xlu2 %v158_v25 }
 0x101   :  { %v77_v26 = vpop.xlane.xlu0 %76 }
 0x102   :  { %v63_v27 = vpop.xlane.xlu2 %62 }
 0x103   :  { %159 = vrcp.f32 %v63_v27  ;;  %v107_v46 = vand.u32 2147483648, %v63_v27  ;;  %vm101_vm1 = vweird.f32 %v63_v27  ;;  %v105_v49 = vand.u32 2147483647, %v63_v27 }
 0x104   :  { %161 = vlog2.f32 %v77_v26 }
 0x105   :  { %163 = vlog2.f32 %v63_v27  ;;  %v108_v56 = vor.u32 1.1754944e-38, %v107_v46  ;;  %vm106_vm5 = vcmp.eq.f32.partialorder %v105_v49, 8.507059e+37 }
 0x109   :  { %v160_v28 = vpop.eup %159  ;;  %v79_v29 = vpop.xlane.xlu1 %78 }
 0x10a   :  { %v162_v30 = vpop.eup %161  ;;  %v97_v31 = vmul.f32 %v160_v28, %v63_v27  ;;  %165 = vlog2.f32 %v79_v29  ;;  %v65_v32 = vpop.xlane.xlu2 %64  ;;  %vm102_vm0 = vweird.f32 %v160_v28 }
 0x10b   :  { %v164_v33 = vpop.eup %163  ;;  %167 = vlog2.f32 %v65_v32  ;;  %v81_v36 = vmul.f32 0.6931472, %v162_v30  ;;  %vm103_vm2 = vmor %vm101_vm1, %vm102_vm0  ;;  %v119_v51 = vand.u32 2147483647, %v65_v32  ;;  %v121_v52 = vand.u32 2147483648, %v65_v32 }
 0x10c   :  { %v98_v34 = vsub.f32 1.0, %v97_v31  ;;  %169 = vrcp.f32 %v65_v32  ;;  %v85_v35 = vmul.f32 0.6931472, %v164_v33  ;;  %vm115_vm4 = vweird.f32 %v65_v32 }
 0x10d   :  { %v122_v58 = vor.u32 1.1754944e-38, %v121_v52  ;;  %vm120_vm7 = vcmp.eq.f32.partialorder %v119_v51, 8.507059e+37 }
 0x10e   :  { %v99_v37 = vmul.f32 %v160_v28, %v98_v34  ;;  %v88_v42 = vsub.f32 %v81_v36, %v85_v35 }
 0x110   :  { %v166_v38 = vpop.eup %165  ;;  %v100_v45 = vadd.f32 %v160_v28, %v99_v37  ;;  %v92_v50 = vadd.f32 %v90_v14, %v88_v42 }
 0x111   :  { %v168_v39 = vpop.eup %167  ;;  %v83_v40 = vmul.f32 0.6931472, %v166_v38 }
 0x112   :  { %v170_v41 = vpop.eup %169  ;;  %v87_v43 = vmul.f32 0.6931472, %v168_v39  ;;  %v104_v55 = vsel %vm103_vm2, %v160_v28, %v100_v45  ;;  %v94_v60 = vmul.f32 %v154_v23, %v92_v50 }
 0x113   :  { %v111_v44 = vmul.f32 %v170_v41, %v65_v32  ;;  %vm116_vm3 = vweird.f32 %v170_v41  ;;  %v109_v59 = vsel %vm106_vm5, %v108_v56, %v104_v55 }
 0x114   :  { %v89_v47 = vsub.f32 %v83_v40, %v87_v43  ;;  %vm117_vm6 = vmor %vm115_vm4, %vm116_vm3  ;;  %v124_v0 = vmul.f32 %v109_v59, %v94_v60 }
 0x115   :  { %v112_v48 = vsub.f32 1.0, %v111_v44 }
 0x116   :  { %v93_v54 = vadd.f32 %v91_v22, %v89_v47 }
 0x117   :  { %v113_v53 = vmul.f32 %v170_v41, %v112_v48 }
 0x118   :  { %v95_v61 = vmul.f32 %v158_v25, %v93_v54 }
 0x119   :  { %v114_v57 = vadd.f32 %v170_v41, %v113_v53 }
 0x11b   :  { %v118_v62 = vsel %vm117_vm6, %v170_v41, %v114_v57 }
 0x11c   :  { %v123_v63 = vsel %vm120_vm7, %v122_v58, %v118_v62 }
 0x11d   :  { %v125_v1 = vmul.f32 %v123_v63, %v95_v61 }
 0x11f   :  { %v126_v2 = vadd.f32 %v125_v1, %v124_v0 }
 0x121   :  { %127 = vst [vmem:[#allocation7] sm:$0xff] %v126_v2 }
 0x122   :  { %138 = dma.vmem_to_hbm [thread:$0]  %s134_s1, 128, %s136_s23, [#allocation4]  }
 0x123   :  { %247 = dma.done.wait [#allocation4], 128  }
 0x124   :  { %248 = vsyncadd [#allocation4], 4294967168 }
 0x125   :  { %143 = vsyncpa [#allocation3], 1 }
 0x126   :  { %144 = vsyncpa [#allocation6], 1 }
 0x127   :  { %145 = vsyncpa [#allocation4], 1 }

</bundles_post_ra>
